<compile_context>
chip_gen: v7x
topology: tpu7x:2x2x1
jax: 0.10.0
libtpu: 0.0.40
codegen_flags: <defaults>
</compile_context>

<pallas_src>
import jax
import jax.numpy as jnp
from jax.experimental import pallas as pl
from jax.experimental.pallas import tpu as pltpu

_LANE = 128


def _latent_kernel(x_ref, w_ref, b_ref, o_ref):
    # x_ref: (NB, C_in, TM)   NB batch elements, one spatial tile
    # w_ref: (C_out, C_in)    VMEM-resident across the grid
    # b_ref: (C_out, 1)       VMEM-resident across the grid
    # o_ref: (NB, C_out, TM)  lane-dense output tile
    w = w_ref[...]                                  # (C_out, C_in)
    b = b_ref[...]                                  # (C_out, 1)
    for i in range(x_ref.shape[0]):                 # NB is a small static const
        acc = jnp.dot(w, x_ref[i], preferred_element_type=jnp.float32)
        o_ref[i] = (acc + b).astype(o_ref.dtype)


def latent_layer_pallas(x_nchw, weight, bias, *,
                        tm_target=65536, step_bytes_target=2 << 20):
    """1x1 conv forward pass (LatentLayer.forward).

    Args:
      x_nchw: (N, C_in, H, W) float32
      weight: (C_out, C_in, 1, 1) float32  (PyTorch Conv2d layout)
      bias:   (C_out,) float32
    Returns:
      (N, C_out, H, W) float32
    """
    N, C_in, H, W = x_nchw.shape
    C_out = weight.shape[0]
    HW = H * W

    # Channel-major views: no transposes, no extra HBM traffic.
    x3 = x_nchw.reshape(N, C_in, HW)                # (N, C_in, HW)  -- view
    w_mat = weight.reshape(C_out, C_in)             # (C_out, C_in)
    b_col = bias.reshape(C_out, 1)                  # (C_out, 1)

    itemsize = jnp.dtype(x_nchw.dtype).itemsize
    bytes_per_px = (C_in + C_out) * itemsize        # HBM read + write per pixel
    hw_lanes = pl.cdiv(HW, _LANE) * _LANE

    # ---- tile selection -------------------------------------------------
    # Target ~step_bytes_target of HBM traffic per grid step (amortizes the
    # ~600-cycle per-step pipeline overhead), while keeping >= min_steps grid
    # steps when the problem is big enough (feeds both v7x TCs).
    min_steps = 4
    px_target = max(_LANE, step_bytes_target // bytes_per_px)
    total_px = N * hw_lanes
    if total_px > min_steps * _LANE:
        px_target = min(px_target, max(_LANE, total_px // min_steps))

    if hw_lanes >= px_target:
        # Large images: tile the (flattened) spatial axis only.
        nb = 1
        tm = min(tm_target, px_target, hw_lanes)
        tm = max(_LANE, (tm // _LANE) * _LANE)
    else:
        # Small images: whole image per step, block over batch instead.
        # NB consecutive batch slabs are contiguous in HBM -> one DMA.
        tm = hw_lanes
        nb = int(min(N, max(1, px_target // hw_lanes)))

    grid = (pl.cdiv(N, nb), pl.cdiv(HW, tm))

    # Double-buffered VMEM footprint (f32 sublane packing: <8 rows pad to 8).
    def _sub(c):
        return ((c + 7) // 8) * 8
    step_vmem = 2 * nb * (_sub(C_in) + _sub(C_out)) * tm * itemsize
    vmem_limit = int(min(64 << 20, max(32 << 20, 2 * step_vmem)))

    out_flat = pl.pallas_call(
        _latent_kernel,
        out_shape=jax.ShapeDtypeStruct((N, C_out, HW), x_nchw.dtype),
        grid=grid,
        in_specs=[
            pl.BlockSpec((nb, C_in, tm), lambda n, m: (n, 0, m)),
            pl.BlockSpec((C_out, C_in), lambda n, m: (0, 0)),
            pl.BlockSpec((C_out, 1), lambda n, m: (0, 0)),
        ],
        out_specs=pl.BlockSpec((nb, C_out, tm), lambda n, m: (n, 0, m)),
        compiler_params=pltpu.CompilerParams(
            dimension_semantics=("parallel", "parallel"),
            vmem_limit_bytes=vmem_limit),
    )(x3, w_mat, b_col)

    return out_flat.reshape(N, C_out, H, W)


def reference_conv1x1(x_nchw, weight, bias):
    # Pure-JAX reference: einsum over the channel axis.
    w = weight.reshape(weight.shape[0], weight.shape[1])  # (C_out, C_in)
    y = jnp.einsum("ncHW,oc->noHW", x_nchw, w)
    return y + bias.reshape(1, -1, 1, 1)


if __name__ == "__main__":
    key = jax.random.PRNGKey(0)
    k_x, k_w, k_b = jax.random.split(key, 3)

    N, C_in, C_out, Hdim, Wdim = 2, 4, 8, 16, 16

    x = jax.random.normal(k_x, (N, C_in, Hdim, Wdim), dtype=jnp.float32)
    # Deterministic parameter init (synthetic; shapes match nn.Conv2d(4, 8, 1))
    fan_in = C_in  # kernel_size = 1
    bound = 1.0 / (fan_in ** 0.5)
    weight = jax.random.uniform(
        k_w, (C_out, C_in, 1, 1), dtype=jnp.float32, minval=-bound, maxval=bound)
    bias = jax.random.uniform(
        k_b, (C_out,), dtype=jnp.float32, minval=-bound, maxval=bound)

    out = latent_layer_pallas(x, weight, bias)
    out = jax.block_until_ready(out)

    ref = reference_conv1x1(x, weight, bias)
    assert out.shape == (N, C_out, Hdim, Wdim), out.shape
    assert jnp.allclose(out, ref, atol=1e-5, rtol=1e-5), "mismatch vs reference"

    # Also exercise a ragged-spatial / larger shape to cover the partial-block
    # and spatial-tiling paths without any jnp.pad.
    x2 = jax.random.normal(key, (3, C_in, 33, 47), dtype=jnp.float32)
    out2 = jax.block_until_ready(latent_layer_pallas(x2, weight, bias))
    ref2 = reference_conv1x1(x2, weight, bias)
    assert jnp.allclose(out2, ref2, atol=1e-5, rtol=1e-5), "ragged mismatch"

    print("KERNEL_OK")
</pallas_src>

<mosaic_0001>
module attributes {stable_mosaic.version = 11 : i64} {
  func.func @_latent_kernel(%arg0: i32, %arg1: i32, %arg2: memref<2x4x256xf32, #tpu.memory_space<vmem>>, %arg3: memref<8x4xf32, #tpu.memory_space<vmem>>, %arg4: memref<8x1xf32, #tpu.memory_space<vmem>>, %arg5: memref<2x8x256xf32, #tpu.memory_space<vmem>>) attributes {dimension_semantics = [#tpu.dimension_semantics<parallel>, #tpu.dimension_semantics<parallel>], iteration_bounds = array<i64: 1, 1>, scalar_prefetch = 0 : i64, scratch_operands = 0 : i64, tpu.core_type = #tpu.core_type<tc>, window_params = [{transform_indices = @transform_0, window_bounds = array<i64: 2, 4, 256>}, {pipeline_mode = #tpu.pipeline_mode<synchronous>, transform_indices = @transform_1, window_bounds = array<i64: 8, 4>}, {pipeline_mode = #tpu.pipeline_mode<synchronous>, transform_indices = @transform_2, window_bounds = array<i64: 8, 1>}, {transform_indices = @transform_3, window_bounds = array<i64: 2, 8, 256>}]} {
    %c0 = arith.constant 0 : index
    %c0_0 = arith.constant 0 : index
    %0 = vector.load %arg3[%c0, %c0_0] : memref<8x4xf32, #tpu.memory_space<vmem>>, vector<8x4xf32>
    %c0_1 = arith.constant 0 : index
    %c0_2 = arith.constant 0 : index
    %1 = vector.load %arg4[%c0_1, %c0_2] : memref<8x1xf32, #tpu.memory_space<vmem>>, vector<8x1xf32>
    %c0_3 = arith.constant 0 : index
    %c0_4 = arith.constant 0 : index
    %c0_5 = arith.constant 0 : index
    %2 = vector.load %arg2[%c0_3, %c0_4, %c0_5] : memref<2x4x256xf32, #tpu.memory_space<vmem>>, vector<1x4x256xf32>
    %3 = vector.shape_cast %2 : vector<1x4x256xf32> to vector<4x256xf32>
    %cst = arith.constant dense<0.000000e+00> : vector<8x256xf32>
    %4 = tpu.matmul %0, %3, %cst {dimension_numbers = #tpu.dot_dimension_numbers<[1], [0], [0], [1], [0, 0, 1, 1], [], []>} : vector<8x4xf32>, vector<4x256xf32>, vector<8x256xf32> -> vector<8x256xf32>
    %5 = vector.broadcast %1 : vector<8x1xf32> to vector<8x256xf32>
    %6 = arith.addf %4, %5 : vector<8x256xf32>
    %c0_6 = arith.constant 0 : index
    %c0_7 = arith.constant 0 : index
    %c0_8 = arith.constant 0 : index
    %7 = vector.load %arg5[%c0_6, %c0_7, %c0_8] : memref<2x8x256xf32, #tpu.memory_space<vmem>>, vector<1x8x256xf32>
    %8 = vector.shape_cast %7 : vector<1x8x256xf32> to vector<8x256xf32>
    %9 = vector.shape_cast %6 : vector<8x256xf32> to vector<1x8x256xf32>
    tpu.vector_store %arg5[%c0_6, %c0_7, %c0_8], %9 {strides = array<i32>} : memref<2x8x256xf32, #tpu.memory_space<vmem>>, vector<1x8x256xf32>,
    %c1 = arith.constant 1 : index
    %c0_9 = arith.constant 0 : index
    %c0_10 = arith.constant 0 : index
    %10 = vector.load %arg2[%c1, %c0_9, %c0_10] : memref<2x4x256xf32, #tpu.memory_space<vmem>>, vector<1x4x256xf32>
    %11 = vector.shape_cast %10 : vector<1x4x256xf32> to vector<4x256xf32>
    %cst_11 = arith.constant dense<0.000000e+00> : vector<8x256xf32>
    %12 = tpu.matmul %0, %11, %cst_11 {dimension_numbers = #tpu.dot_dimension_numbers<[1], [0], [0], [1], [0, 0, 1, 1], [], []>} : vector<8x4xf32>, vector<4x256xf32>, vector<8x256xf32> -> vector<8x256xf32>
    %13 = vector.broadcast %1 : vector<8x1xf32> to vector<8x256xf32>
    %14 = arith.addf %12, %13 : vector<8x256xf32>
    %c1_12 = arith.constant 1 : index
    %c0_13 = arith.constant 0 : index
    %c0_14 = arith.constant 0 : index
    %15 = vector.load %arg5[%c1_12, %c0_13, %c0_14] : memref<2x8x256xf32, #tpu.memory_space<vmem>>, vector<1x8x256xf32>
    %16 = vector.shape_cast %15 : vector<1x8x256xf32> to vector<8x256xf32>
    %17 = vector.shape_cast %14 : vector<8x256xf32> to vector<1x8x256xf32>
    tpu.vector_store %arg5[%c1_12, %c0_13, %c0_14], %17 {strides = array<i32>} : memref<2x8x256xf32, #tpu.memory_space<vmem>>, vector<1x8x256xf32>,
    return
  }
  func.func @transform_0(%arg0: i32, %arg1: i32) -> (i32, i32, i32) {
    %c0_i32 = arith.constant 0 : i32
    %c0_i32_0 = arith.constant 0 : i32
    return %arg0, %c0_i32, %arg1 : i32, i32, i32
  }
  func.func @transform_1(%arg0: i32, %arg1: i32) -> (i32, i32) {
    %c0_i32 = arith.constant 0 : i32
    %c0_i32_0 = arith.constant 0 : i32
    %c0_i32_1 = arith.constant 0 : i32
    return %c0_i32, %c0_i32_0 : i32, i32
  }
  func.func @transform_2(%arg0: i32, %arg1: i32) -> (i32, i32) {
    %c0_i32 = arith.constant 0 : i32
    %c0_i32_0 = arith.constant 0 : i32
    %c0_i32_1 = arith.constant 0 : i32
    return %c0_i32, %c0_i32_0 : i32, i32
  }
  func.func @transform_3(%arg0: i32, %arg1: i32) -> (i32, i32, i32) {
    %c0_i32 = arith.constant 0 : i32
    %c0_i32_0 = arith.constant 0 : i32
    return %arg0, %c0_i32, %arg1 : i32, i32, i32
  }
}

</mosaic_0001>

<bundles_post_ra>
// kernel: tpu_custom_call.1
= control target key start
LH: loop header
LB: loop body
LE: loop exit
PB: predicated region body
PF: predicated region fallthrough
CT: control target
= control target key end

     0   :  { %vm29_vm0 = vcmask 1043456   ;;  %v244_v4 = vmov 0.0   ;;  %s297_s0 = inlined_call_operand.vmem [shape: f32[2,4,256], index: 0, kind: input, shape index: {}]   ;;  %s298_s1 = inlined_call_operand.vmem [shape: f32[8,4], index: 1, kind: input, shape index: {}]   ;;  %s299_s2 = inlined_call_operand.vmem [shape: f32[8,1], index: 2, kind: input, shape index: {}]   ;;  %s300_s3 = inlined_call_operand.hbm [shape: f32[2,8,256], index: 3, kind: output, shape index: {}]  }
   0x1   :  { %v17_v0 = vld [vmem:[%s297_s0] sm:$0xff]  ;;  %v208_v1 = vld [vmem:[%s297_s0 + $0x8] sm:$0xff]  ;;  %98 = vmatprep.mubr.f32.mxu0 %v244_v4  ;;  %179 = vmatprep.mubr.f32.mxu1 %v244_v4 }
   0x2   :  { %v24_v2 = vcombine.high %v17_v0, %v17_v0  ;;  %v110_v3 = vcombine.high %v208_v1, %v208_v1 }
   0x3   :  { %8 = vsyncpa [#allocation3], 0  ;;  %v15_v5 = vld [vmem:[%s298_s1] sm:$0xff]  ;;  %vm25_vm1 = vcmask 31744   ;;  %v245_v6 = vmov 0   ;;  %s246_s0 = smov [#allocation2]  }
   0x4   :  { %217 = vset.pattern.permute.xlu0 %v245_v6  ;;  %205 = vmatprep.subr.msk.mxu0 %vm29_vm0, %v24_v2  ;;  %v16_v7 = vld [vmem:[%s299_s2] sm:$0xff]  ;;  %s194_s1 = sshll.u32 %s246_s0, 4  ;;  %s195_s1 = int_to_ptr.vmem [resolvable:$true] %s194_s1 }
   0x5   :  { %209 = vmatprep.subr.msk.mxu1 %vm29_vm0, %v110_v3  ;;  %206 = vmatpush1.msk.msra.mxu0 %vm29_vm0, %v17_v0  ;;  %s220_s2 = scalar_lea.vmem %s195_s1, 512  ;;  %p225_p1 = scmp.lt.s32.totalorder %s195_s1, %s195_s1 }
   0x6   :  { %210 = vmatpush1.msk.msra.mxu1 %vm29_vm0, %v208_v1  ;;  %207 = vmatmul.mubr.msk.f32.vlgmr.msra.gmra.mrb[0].mxu0 %vm25_vm1, %v15_v5  ;;  %p221_p0 = scmp.ne.s32.totalorder %s195_s1, %s220_s2  ;;  %p226_p2 = scmp.lt.s32.totalorder %s220_s2, %s220_s2 }
   0x7   :  { %211 = vmatmul.mubr.msk.f32.vlgmr.msra.gmra.mrb[0].mxu1 %vm25_vm1, %v15_v5  ;;  %20 = vperm.xlu0 %217, %v16_v7  }
   0x8   :  { %p227_p3 = por %p226_p2, %p225_p1 }
   0xa   :  { %p228_p4 = pnand %p227_p3, %p221_p0 }
  0x86   :  { %v21_v8 = vpop.permute.xlu0 %20 }
  0xd9   :  { %v100_v9 = vpop.f32.mrb[0].mxu0 }
  0xda   :  { %v181_v10 = vpop.f32.mrb[0].mxu1  ;;  %v101_v11 = vadd.f32 %v100_v9, %v21_v8  ;;  %v102_v13 = vpop.f32.mrb[1].mxu0 }
  0xdb   :  { %v182_v12 = vadd.f32 %v181_v10, %v21_v8  ;;  %v183_v14 = vpop.f32.mrb[1].mxu1  ;;  %v103_v15 = vadd.f32 %v102_v13, %v21_v8 }
  0xdc   :  { %v184_v16 = vadd.f32 %v183_v14, %v21_v8  ;;  %105 = vst [vmem:[#allocation2] sm:$0xff] %v101_v11 }
  0xdd   :  { %187 = vst [vmem:[#allocation2 + $0x10] sm:$0xff] %v182_v12  ;;  %106 = vst [vmem:[#allocation2 + $0x8] sm:$0xff] %v103_v15 }
  0xde   :  { %188 = vst [vmem:[#allocation2 + $0x18] sm:$0xff] %v184_v16 }
  0xdf   :  { %231 = shalt.err (!%p228_p4)
}
  0xe0   :  { %s232_s22 = scalar_lea.hbm %s300_s3, 512 }
  0xe1   :  { %p233_p5 = scmp.ne.s32.totalorder %s300_s3, %s232_s22  ;;  %p236_p6 = scmp.lt.u32.totalorder %s232_s22, %s300_s3 }
  0xe3   :  { %p238_p7 = pnand %p236_p6, %p233_p5 }
  0xe5   :  { %241 = shalt.err (!%p238_p7)
}
  0xe6   :  { %s247_s27 = smov 256   ;;  %s248_s28 = smov 16  }
  0xe7   :  { %200 = dma.vmem_to_hbm [thread:$0]  %s195_s1, 512, %s300_s3, [#allocation3], %s247_s27, %s247_s27, %s248_s28  }
  0xe8   :  { %242 = dma.done.wait [#allocation3], 512  }
  0xe9   :  { %243 = vsyncadd [#allocation3], 4294966784 }
  0xea   :  { %204 = vsyncpa [#allocation3], 1 }

</bundles_post_ra>
